<compile_context>
chip_gen: v6e
topology: v6e:2x2x1
jax: 0.10.0
libtpu: 0.0.40
codegen_flags: <defaults>
</compile_context>

<pallas_src>
import functools

import jax
import jax.numpy as jnp
from jax.experimental import pallas as pl
from jax.experimental.pallas import tpu as pltpu


# ----------------------------------------------------------------------------
# helpers
# ----------------------------------------------------------------------------
def _round_up(x, m):
    return (x + m - 1) // m * m


def _pick_tile(padded, pref, mult):
    """Largest multiple of `mult` that divides `padded` and is <= pref."""
    t = min(pref, padded)
    while padded % t:
        t -= mult
    return t


def _pad2d(a, rows, cols):
    out = jnp.zeros((rows, cols), a.dtype)
    return out.at[: a.shape[0], : a.shape[1]].set(a)


def _pad_offsets(splits):
    offs, cur = [], 0
    for s in splits:
        offs.append(cur)
        cur += _round_up(s, 128)
    return offs, cur


def _pack_w(w, in_splits, out_splits):
    """Pack a logical (K, N) f32 weight into a 128-aligned bf16 block layout:
    each logical chunk along K / N is placed at its own 128-aligned offset."""
    io, kp = _pad_offsets(in_splits)
    oo, np_ = _pad_offsets(out_splits)
    wp = jnp.zeros((kp, np_), jnp.bfloat16)
    r0 = 0
    for si, ro in zip(in_splits, io):
        c0 = 0
        for so, co in zip(out_splits, oo):
            wp = wp.at[ro:ro + si, co:co + so].set(
                w[r0:r0 + si, c0:c0 + so].astype(jnp.bfloat16))
            c0 += so
        r0 += si
    return wp


def _pack_b(b, out_splits):
    oo, np_ = _pad_offsets(out_splits)
    bp = jnp.zeros((1, np_), jnp.float32)
    c0 = 0
    for so, co in zip(out_splits, oo):
        bp = bp.at[0, co:co + so].set(b[c0:c0 + so])
        c0 += so
    return bp


# ----------------------------------------------------------------------------
# Kernel 1: fused chain of linears (weights VMEM-resident, grid over row tiles)
# ----------------------------------------------------------------------------
def _chain_kernel(*refs, n_lin, has_res):
    x_ref = refs[0]
    idx = 2 if has_res else 1
    res_ref = refs[1] if has_res else None
    wb = refs[idx: idx + 2 * n_lin]
    o_ref = refs[idx + 2 * n_lin]

    h = x_ref[...].astype(jnp.bfloat16)
    y = None
    for layer in range(n_lin):
        w = wb[2 * layer][...]
        b = wb[2 * layer + 1][...]
        y = jnp.dot(h, w, preferred_element_type=jnp.float32) + b
        if layer < n_lin - 1:
            y = jnp.where(y > 0, y, 0.01 * y)        # nn.LeakyReLU default slope
            h = y.astype(jnp.bfloat16)
    if has_res:
        y = y + res_ref[...]
    o_ref[...] = y


def linear_chain(x, lins, res=None):
    """x: (Rp, Kp) f32, lins: list of packed dict(w, b), optional residual
    res: (Rp, Np).  Returns (Rp, Np) f32.  Rows must be a multiple of 128."""
    rp, kp = x.shape
    assert rp % 128 == 0 and kp == lins[0]["w"].shape[0]
    np_ = lins[-1]["w"].shape[1]
    tm = _pick_tile(rp, 256, 128)
    in_specs = [pl.BlockSpec((tm, kp), lambda i: (i, 0))]
    args = [x]
    if res is not None:
        assert res.shape == (rp, np_)
        in_specs.append(pl.BlockSpec((tm, np_), lambda i: (i, 0)))
        args.append(res)
    for lin in lins:
        kw, nw = lin["w"].shape
        in_specs.append(pl.BlockSpec((kw, nw), lambda i: (0, 0)))
        in_specs.append(pl.BlockSpec((1, nw), lambda i: (0, 0)))
        args += [lin["w"], lin["b"]]
    return pl.pallas_call(
        functools.partial(_chain_kernel, n_lin=len(lins), has_res=res is not None),
        out_shape=jax.ShapeDtypeStruct((rp, np_), jnp.float32),
        grid=(rp // tm,),
        in_specs=in_specs,
        out_specs=pl.BlockSpec((tm, np_), lambda i: (i, 0)),
        compiler_params=pltpu.CompilerParams(dimension_semantics=("parallel",)),
    )(*args)


# ----------------------------------------------------------------------------
# Kernel 2: fused GENConv root-add + GENConv MLP + Q/K/V/skip projections
# ----------------------------------------------------------------------------
def _gen_qkvs_kernel(o_ref, agg_ref, wg_ref, bg_ref, wt_ref, wb_ref, bq_ref,
                     q_ref, k_ref, v_ref, s_ref, *, hdp):
    o32 = o_ref[...]
    o_bf = o32.astype(jnp.bfloat16)
    agg_in = (agg_ref[...] + o32).astype(jnp.bfloat16)        # GENConv root add
    agg2 = jnp.dot(agg_in, wg_ref[...],
                   preferred_element_type=jnp.float32) + bg_ref[...]
    y = (jnp.dot(o_bf, wt_ref[...], preferred_element_type=jnp.float32)
         + jnp.dot(agg2.astype(jnp.bfloat16), wb_ref[...],
                   preferred_element_type=jnp.float32)
         + bq_ref[...])
    q_ref[...] = y[:, 0 * hdp:1 * hdp]
    k_ref[...] = y[:, 1 * hdp:2 * hdp]
    v_ref[...] = y[:, 2 * hdp:3 * hdp]
    s_ref[...] = y[:, 3 * hdp:4 * hdp]


def gen_qkvs_call(o, agg, lp_gen, lp_qkvs, hdp):
    ap, dp = o.shape
    nq = lp_qkvs["w_top"].shape[1]
    assert nq == 4 * hdp
    tm = _pick_tile(ap, 256, 128)
    in_specs = [
        pl.BlockSpec((tm, dp), lambda i: (i, 0)),
        pl.BlockSpec((tm, dp), lambda i: (i, 0)),
        pl.BlockSpec(lp_gen["w"].shape, lambda i: (0, 0)),
        pl.BlockSpec(lp_gen["b"].shape, lambda i: (0, 0)),
        pl.BlockSpec(lp_qkvs["w_top"].shape, lambda i: (0, 0)),
        pl.BlockSpec(lp_qkvs["w_bot"].shape, lambda i: (0, 0)),
        pl.BlockSpec(lp_qkvs["b"].shape, lambda i: (0, 0)),
    ]
    out_specs = [pl.BlockSpec((tm, hdp), lambda i: (i, 0))] * 4
    out_shape = [jax.ShapeDtypeStruct((ap, hdp), jnp.float32)] * 4
    return pl.pallas_call(
        functools.partial(_gen_qkvs_kernel, hdp=hdp),
        out_shape=out_shape, grid=(ap // tm,),
        in_specs=in_specs, out_specs=out_specs,
        compiler_params=pltpu.CompilerParams(dimension_semantics=("parallel",)),
    )(o, agg, lp_gen["w"], lp_gen["b"],
      lp_qkvs["w_top"], lp_qkvs["w_bot"], lp_qkvs["b"])


# ----------------------------------------------------------------------------
# Kernel 3: multi-operand segment sum (bf16 one-hot matmul, f32 accumulation)
# ----------------------------------------------------------------------------
def _segsum_kernel(seg_ref, *refs, n_ops, ts):
    data_refs = refs[:n_ops]
    out_refs = refs[n_ops:2 * n_ops]
    acc_refs = refs[2 * n_ops:]
    k = pl.program_id(1)

    @pl.when(k == 0)
    def _():
        for a in acc_refs:
            a[...] = jnp.zeros_like(a)

    seg = seg_ref[...]                                         # (1, TR) int32
    rows = (jax.lax.broadcasted_iota(jnp.int32, (ts, seg.shape[1]), 0)
            + pl.program_id(0) * ts)
    onehot = (rows == seg).astype(jnp.bfloat16)                # built in VMEM
    for d_ref, a_ref in zip(data_refs, acc_refs):
        a_ref[...] += jnp.dot(onehot, d_ref[...].astype(jnp.bfloat16),
                              preferred_element_type=jnp.float32)

    @pl.when(k == pl.num_programs(1) - 1)
    def _():
        for o_ref, a_ref in zip(out_refs, acc_refs):
            o_ref[...] = a_ref[...]


def segment_sum_multi(seg_row, datas, num_seg_padded):
    """seg_row: (1, Rp) int32 (pad = -1); datas: list of (Rp, Wi) f32.
    Returns list of (num_seg_padded, Wi) f32 scatter-adds."""
    rp = seg_row.shape[1]
    sp = num_seg_padded
    ts = _pick_tile(sp, 128, 8)
    tr = _pick_tile(rp, 512, 128)
    in_specs = [pl.BlockSpec((1, tr), lambda i, k: (0, k))]
    for dat in datas:
        in_specs.append(pl.BlockSpec((tr, dat.shape[1]), lambda i, k: (k, 0)))
    out_specs = [pl.BlockSpec((ts, dat.shape[1]), lambda i, k: (i, 0))
                 for dat in datas]
    out_shape = [jax.ShapeDtypeStruct((sp, dat.shape[1]), jnp.float32)
                 for dat in datas]
    scratch = [pltpu.VMEM((ts, dat.shape[1]), jnp.float32) for dat in datas]
    outs = pl.pallas_call(
        functools.partial(_segsum_kernel, n_ops=len(datas), ts=ts),
        out_shape=out_shape,
        grid=(sp // ts, rp // tr),
        in_specs=in_specs, out_specs=out_specs, scratch_shapes=scratch,
        compiler_params=pltpu.CompilerParams(
            dimension_semantics=("parallel", "arbitrary")),
    )(seg_row, *datas)
    if not isinstance(outs, (list, tuple)):
        outs = [outs]
    return list(outs)


# ----------------------------------------------------------------------------
# Kernel 4: graph-LayerNorm statistics (per-graph sum & sum of squares, f32)
# ----------------------------------------------------------------------------
def _ln_stats_kernel(seg_ref, x_ref, o_ref, acc_ref, *, ts):
    k = pl.program_id(1)

    @pl.when(k == 0)
    def _():
        acc_ref[...] = jnp.zeros_like(acc_ref)

    x = x_ref[...]                                             # (TR, DP) f32
    s1 = jnp.sum(x, axis=-1, keepdims=True)
    s2 = jnp.sum(x * x, axis=-1, keepdims=True)
    lane = jax.lax.broadcasted_iota(jnp.int32, (x.shape[0], 128), 1)
    st = jnp.where(lane == 0, s1, 0.0) + jnp.where(lane == 1, s2, 0.0)
    seg = seg_ref[...]
    rows = (jax.lax.broadcasted_iota(jnp.int32, (ts, seg.shape[1]), 0)
            + pl.program_id(0) * ts)
    onehot = (rows == seg).astype(jnp.float32)
    acc_ref[...] += jnp.dot(onehot, st, preferred_element_type=jnp.float32)

    @pl.when(k == pl.num_programs(1) - 1)
    def _():
        o_ref[...] = acc_ref[...]


def ln_stats_pallas(x, seg_row, sp):
    rp, dpx = x.shape
    ts = _pick_tile(sp, 128, 8)
    tr = _pick_tile(rp, 512, 128)
    return pl.pallas_call(
        functools.partial(_ln_stats_kernel, ts=ts),
        out_shape=jax.ShapeDtypeStruct((sp, 128), jnp.float32),
        grid=(sp // ts, rp // tr),
        in_specs=[pl.BlockSpec((1, tr), lambda i, k: (0, k)),
                  pl.BlockSpec((tr, dpx), lambda i, k: (k, 0))],
        out_specs=pl.BlockSpec((ts, 128), lambda i, k: (i, 0)),
        scratch_shapes=[pltpu.VMEM((ts, 128), jnp.float32)],
        compiler_params=pltpu.CompilerParams(
            dimension_semantics=("parallel", "arbitrary")),
    )(seg_row, x)


def graph_layer_norm(x, batch_seg, batch_g, counts, d_real, colmask, eps=1e-5):
    """torch_geometric.nn.LayerNorm(mode='graph', affine=False)."""
    stats = ln_stats_pallas(x, batch_seg, counts.shape[0])     # (GS, 128)
    norm = jnp.maximum(counts, 1.0) * d_real
    mean = stats[:, 0] / norm
    var = jnp.maximum(stats[:, 1] / norm - mean * mean, 0.0)
    inv = jax.lax.rsqrt(var + eps)
    return (x - mean[batch_g][:, None]) * inv[batch_g][:, None] * colmask


# ----------------------------------------------------------------------------
# Parameters (deterministic synthetic init, pre-packed bf16 weights + f32 bias)
# ----------------------------------------------------------------------------
def _raw_linear(key, n_in, n_out, bias=True, scale=0.1):
    k1, k2 = jax.random.split(key)
    w = scale * jax.random.normal(k1, (n_in, n_out), jnp.float32)
    b = (scale * jax.random.normal(k2, (n_out,), jnp.float32)
         if bias else jnp.zeros((n_out,), jnp.float32))
    return w, b


def _lin_params(key, n_in, n_out, in_splits=None, out_splits=None,
                bias=True, scale=0.1):
    w, b = _raw_linear(key, n_in, n_out, bias, scale)
    return dict(w=_pack_w(w, in_splits or [n_in], out_splits or [n_out]),
                b=_pack_b(b, out_splits or [n_out]))


def _mlp3_params(key, n_in, d):
    k = jax.random.split(key, 3)
    return [_lin_params(k[0], n_in, d), _lin_params(k[1], d, d),
            _lin_params(k[2], d, d)]


def _fused_qkvs_params(key, d, h):
    ws, bs = [], []
    for kx in jax.random.split(key, 4):                        # Q, K, V, skip
        w, b = _raw_linear(kx, 2 * d, h * d)
        ws.append(w)
        bs.append(b)
    wfull = jnp.concatenate(ws, axis=1)
    bfull = jnp.concatenate(bs, axis=0)
    out_splits = [d] * (4 * h)                                 # per-head blocks
    return dict(w_top=_pack_w(wfull[:d], [d], out_splits),
                w_bot=_pack_w(wfull[d:], [d], out_splits),
                b=_pack_b(bfull, out_splits))


def make_params(key, cfg):
    d, h = cfg["num_emb"], cfg["num_heads"]
    keys = jax.random.split(key, 16)
    layers = []
    for lk in jax.random.split(keys[3], cfg["num_layers"]):
        k = jax.random.split(lk, 8)
        layers.append(dict(
            gen_mlp=_lin_params(k[0], d, d),
            qkvs=_fused_qkvs_params(k[1], d, h),
            lin_edge=_lin_params(k[4], d, h * d, in_splits=[d],
                                 out_splits=[d] * h, bias=False),
            linear=_lin_params(k[6], h * d, d, in_splits=[d] * h, out_splits=[d]),
            ff=[_lin_params(jax.random.fold_in(k[7], 0), d, 4 * d),
                _lin_params(jax.random.fold_in(k[7], 1), 4 * d, d)],
        ))
    return dict(
        x2h=_mlp3_params(keys[0], cfg["x_dim"], d),
        e2h=_mlp3_params(keys[1], cfg["e_dim"], d),
        c2h=_mlp3_params(keys[2], cfg["g_dim"], d),
        layers=layers,
        emb2add_edge=_lin_params(keys[4], 2 * d, 1, in_splits=[d, d]),
        emb2add_node=_lin_params(keys[5], 2 * d, cfg["num_new_node_values"],
                                 in_splits=[d, d]),
        emb2set_node_attr=_lin_params(keys[6], 2 * d, cfg["num_node_attr_logits"],
                                      in_splits=[d, d]),
        emb2set_edge_attr=_lin_params(keys[7], 2 * d, cfg["num_edge_attr_logits"],
                                      in_splits=[d, d]),
        emb2stop=_lin_params(keys[8], 3 * d, 1, in_splits=[d, d, d]),
        emb2reward=_lin_params(keys[9], 3 * d, 1, in_splits=[d, d, d]),
        # TODO(synk): logZ head exists in __init__ but is unused in forward(); omitted.
    )


# ----------------------------------------------------------------------------
# Forward pass
# ----------------------------------------------------------------------------
def graph_transformer_forward(params, x, edge_attr, cond, edge_index, batch, cfg):
    d, h = cfg["num_emb"], cfg["num_heads"]
    dp = _round_up(d, 128)
    hdp = h * dp
    n, e_cnt, g = x.shape[0], edge_attr.shape[0], cond.shape[0]
    n_aug = n + g
    np_ = _round_up(n, 128)
    gp = _round_up(g, 128)
    ap = _round_up(n_aug, 128)

    # --- input MLPs (one fused pallas_call each) -----------------------------
    o_x = linear_chain(_pad2d(x, np_, _round_up(cfg["x_dim"], 128)), params["x2h"])
    e = linear_chain(_pad2d(edge_attr, _round_up(e_cnt, 128),
                            _round_up(cfg["e_dim"], 128)), params["e2h"])
    c = linear_chain(_pad2d(cond, gp, _round_up(cfg["g_dim"], 128)), params["c2h"])

    # --- augmented graph: fully connected virtual node per graph -------------
    batch = batch.astype(jnp.int32)
    u = jnp.arange(n, dtype=jnp.int32)
    v = batch + n
    pre_src = jnp.concatenate([edge_index[0].astype(jnp.int32), u, v])
    pre_dst = jnp.concatenate([edge_index[1].astype(jnp.int32), v, u])
    e_pre = e_cnt + 2 * n
    e_aug = e_pre + n_aug
    ep = _round_up(e_aug, 128)

    aug_e = jnp.zeros((ep, dp), jnp.float32)
    aug_e = aug_e.at[:e_cnt].set(e[:e_cnt])
    aug_e = aug_e.at[e_cnt:e_pre, 0].set(1.0)
    # add_self_loops(..., fill_value='mean')
    pre_dst_seg = jnp.full((1, ep), -1, jnp.int32).at[0, :e_pre].set(pre_dst)
    in_counts = jnp.zeros((ap,), jnp.float32).at[pre_dst].add(1.0)
    loop_sum = segment_sum_multi(pre_dst_seg, [aug_e], ap)[0]
    loop_attr = jnp.where(in_counts[:, None] > 0,
                          loop_sum / jnp.maximum(in_counts[:, None], 1.0), 0.0)
    aug_e = aug_e.at[e_pre:e_aug].set(loop_attr[:n_aug])

    loop_idx = jnp.arange(n_aug, dtype=jnp.int32)
    full_src = jnp.concatenate([pre_src, loop_idx])
    full_dst = jnp.concatenate([pre_dst, loop_idx])
    src_g = jnp.zeros((ep,), jnp.int32).at[:e_aug].set(full_src)     # gather-safe
    dst_g = jnp.zeros((ep,), jnp.int32).at[:e_aug].set(full_dst)
    dst_seg = jnp.full((1, ep), -1, jnp.int32).at[0, :e_aug].set(full_dst)
    dst_max = jnp.full((ep,), n_aug, jnp.int32).at[:e_aug].set(full_dst)

    aug_batch = jnp.concatenate([batch, jnp.arange(g, dtype=jnp.int32)])
    gs = _round_up(g, 8)
    batch_seg = jnp.full((1, ap), -1, jnp.int32).at[0, :n_aug].set(aug_batch)
    batch_g = jnp.zeros((ap,), jnp.int32).at[:n_aug].set(aug_batch)
    g_counts = jnp.zeros((gs,), jnp.float32).at[aug_batch].add(1.0)
    colmask = jnp.zeros((1, dp), jnp.float32).at[0, :d].set(1.0)

    # initial node states: [node embeddings ; per-graph virtual nodes]
    o = (jnp.zeros((ap, dp), jnp.float32)
         .at[:n].set(o_x[:n]).at[n:n_aug].set(c[:g]))

    inv_sqrt_d = 1.0 / jnp.sqrt(jnp.float32(d))
    for lp in params["layers"]:
        # GENConv(d, d, num_layers=1, aggr='add', norm=None)
        msg = jnp.maximum(jnp.take(o, src_g, axis=0) + aug_e, 0.0) + 1e-7
        agg_raw = segment_sum_multi(dst_seg, [msg], ap)[0]
        # fused: root add -> GENConv MLP -> Q/K/V/skip (TransformerConv input
        # is cat([o, agg], 1); the concat is realized as two weight halves)
        q, k, val, skip = gen_qkvs_call(o, agg_raw, lp["gen_mlp"], lp["qkvs"], hdp)
        q = q.reshape(ap, h, dp)
        k = k.reshape(ap, h, dp)
        val = val.reshape(ap, h, dp)
        e_lin = linear_chain(aug_e, [lp["lin_edge"]]).reshape(ep, h, dp)

        # TODO(synk): gathers / segment_max / exp below stay in XLA glue; a
        # PrefetchScalarGridSpec kernel with src/dst in SMEM would keep them in VMEM.
        k_j = jnp.take(k, src_g, axis=0) + e_lin
        alpha = jnp.sum(jnp.take(q, dst_g, axis=0) * k_j, axis=-1) * inv_sqrt_d
        amax = jax.ops.segment_max(alpha, dst_max, num_segments=n_aug + 1)
        ea = jnp.exp(alpha - amax[dst_max])                           # (Ep, H)
        wmsg = (jnp.take(val, src_g, axis=0) + e_lin) * ea[:, :, None]
        ea_w = jnp.zeros((ep, 128), jnp.float32).at[:, :h].set(ea)
        denom, msum = segment_sum_multi(dst_seg,
                                        [ea_w, wmsg.reshape(ep, hdp)], ap)
        t_out = msum.reshape(ap, h, dp) / (denom[:, :h, None] + 1e-16)
        t_out = t_out.reshape(ap, hdp) + skip                        # root skip

        o = graph_layer_norm(linear_chain(t_out, [lp["linear"]], res=o),
                             batch_seg, batch_g, g_counts, d, colmask)
        o = graph_layer_norm(linear_chain(o, lp["ff"], res=o),
                             batch_seg, batch_g, g_counts, d, colmask)

    # --- readout --------------------------------------------------------------
    pool_seg = jnp.full((1, ap), -1, jnp.int32).at[0, :n].set(batch)
    n_counts = jnp.maximum(jnp.zeros((gp,), jnp.float32).at[batch].add(1.0), 1.0)
    pooled = segment_sum_multi(pool_seg, [o], gp)[0] / n_counts[:, None]
    virt_idx = n + jnp.clip(jnp.arange(gp, dtype=jnp.int32), 0, g - 1)
    o_virt = jnp.take(o, virt_idx, axis=0)
    glob = jnp.concatenate([pooled, o_virt, c], axis=1)               # (Gp, 3*DP)
    node_batch = jnp.zeros((ap,), jnp.int32).at[:n].set(batch)
    node_emb = jnp.concatenate([o, jnp.take(c, node_batch, axis=0)], axis=1)
    return node_emb, glob                                             # padded rows


def gfn_forward(params, graph, cond, cfg):
    node_emb, glob = graph_transformer_forward(
        params, graph["x"], graph["edge_attr"], cond,
        graph["edge_index"], graph["batch"], cfg)
    n, g = graph["x"].shape[0], cond.shape[0]
    ne = graph["non_edge_index"]
    eh = graph["edge_index"][:, ::2]
    n_ne, n_eh = ne.shape[1], eh.shape[1]
    nep = _round_up(max(n_ne, 1), 128)
    ehp = _round_up(max(n_eh, 1), 128)
    ne_r = jnp.zeros((nep,), jnp.int32).at[:n_ne].set(ne[0].astype(jnp.int32))
    ne_c = jnp.zeros((nep,), jnp.int32).at[:n_ne].set(ne[1].astype(jnp.int32))
    eh_r = jnp.zeros((ehp,), jnp.int32).at[:n_eh].set(eh[0].astype(jnp.int32))
    eh_c = jnp.zeros((ehp,), jnp.int32).at[:n_eh].set(eh[1].astype(jnp.int32))
    ne_emb = jnp.take(node_emb, ne_r, axis=0) + jnp.take(node_emb, ne_c, axis=0)
    ee_emb = jnp.take(node_emb, eh_r, axis=0) + jnp.take(node_emb, eh_c, axis=0)

    logits = dict(
        stop=linear_chain(glob, [params["emb2stop"]])[:g, :1],
        add_node=linear_chain(node_emb, [params["emb2add_node"]])[
            :n, :cfg["num_new_node_values"]],
        set_node_attr=linear_chain(node_emb, [params["emb2set_node_attr"]])[
            :n, :cfg["num_node_attr_logits"]],
        add_edge=linear_chain(ne_emb, [params["emb2add_edge"]])[:n_ne, :1],
        set_edge_attr=linear_chain(ee_emb, [params["emb2set_edge_attr"]])[
            :n_eh, :cfg["num_edge_attr_logits"]],
    )
    reward = linear_chain(glob, [params["emb2reward"]])[:g, :1]
    return logits, reward


# ----------------------------------------------------------------------------
if __name__ == "__main__":
    cfg = dict(x_dim=5, e_dim=4, g_dim=6, num_emb=32, num_layers=2, num_heads=2,
               num_new_node_values=4, num_node_attr_logits=6, num_edge_attr_logits=3)

    key = jax.random.PRNGKey(0)
    kx, ke, kc, kp, kt = jax.random.split(key, 5)

    # small batched graph: 2 graphs, 3 nodes each, undirected edges stored both ways
    num_nodes, num_graphs = 6, 2
    edge_index = jnp.array([[0, 1, 1, 2, 3, 4, 4, 5],
                            [1, 0, 2, 1, 4, 3, 5, 4]], dtype=jnp.int32)
    non_edge_index = jnp.array([[0, 3], [2, 5]], dtype=jnp.int32)
    batch = jnp.array([0, 0, 0, 1, 1, 1], dtype=jnp.int32)
    graph = dict(
        x=jax.random.normal(kx, (num_nodes, cfg["x_dim"]), jnp.float32),
        edge_attr=jax.random.normal(ke, (edge_index.shape[1], cfg["e_dim"]),
                                    jnp.float32),
        edge_index=edge_index,
        non_edge_index=non_edge_index,
        batch=batch,
    )
    cond = jax.random.normal(kc, (num_graphs, cfg["g_dim"]), jnp.float32)
    params = make_params(kp, cfg)

    # sanity check 1: packed fused-chain linear vs plain JAX (bf16 -> loose tol)
    kt1, kt2, kt3, kt4 = jax.random.split(kt, 4)
    xt = jax.random.normal(kt1, (5, 7), jnp.float32)
    wt = 0.1 * jax.random.normal(kt2, (7, 11), jnp.float32)
    bt = 0.1 * jax.random.normal(kt3, (11,), jnp.float32)
    lin = dict(w=_pack_w(wt, [7], [11]), b=_pack_b(bt, [11]))
    got = linear_chain(_pad2d(xt, 128, 128), [lin])[:5, :11]
    assert jnp.allclose(got, xt @ wt + bt, atol=2e-2, rtol=2e-2), "linear mismatch"

    # sanity check 2: one-hot segment sum vs scatter-add
    dt = jax.random.normal(kt4, (9, 5), jnp.float32)
    sid = jnp.array([0, 2, 1, 0, 2, 2, 1, 0, 1], jnp.int32)
    dt_p = _pad2d(dt, 128, 128)
    sid_p = jnp.full((1, 128), -1, jnp.int32).at[0, :9].set(sid)
    got_s = segment_sum_multi(sid_p, [dt_p], 8)[0][:3, :5]
    ref_s = jnp.zeros((3, 5), jnp.float32).at[sid].add(dt)
    assert jnp.allclose(got_s, ref_s, atol=2e-2, rtol=2e-2), "segsum mismatch"

    fwd = jax.jit(functools.partial(gfn_forward, cfg=cfg))
    logits, reward = fwd(params, graph, cond)
    jax.block_until_ready((logits, reward))

    assert logits["stop"].shape == (num_graphs, 1)
    assert logits["add_node"].shape == (num_nodes, cfg["num_new_node_values"])
    assert logits["set_node_attr"].shape == (num_nodes, cfg["num_node_attr_logits"])
    assert logits["add_edge"].shape == (non_edge_index.shape[1], 1)
    assert logits["set_edge_attr"].shape == (edge_index.shape[1] // 2,
                                             cfg["num_edge_attr_logits"])
    assert reward.shape == (num_graphs, 1)
    assert all(bool(jnp.all(jnp.isfinite(v))) for v in logits.values())
    assert bool(jnp.all(jnp.isfinite(reward)))
    print("KERNEL_OK")
</pallas_src>

<mosaic_0001>
module attributes {stable_mosaic.version = 11 : i64} {
  func.func @_chain_kernel(%arg0: i32, %arg1: memref<128x128xf32, #tpu.memory_space<vmem>>, %arg2: memref<128x128xbf16, #tpu.memory_space<vmem>>, %arg3: memref<1x128xf32, #tpu.memory_space<vmem>>, %arg4: memref<128x128xf32, #tpu.memory_space<vmem>>) attributes {dimension_semantics = [#tpu.dimension_semantics<parallel>], iteration_bounds = array<i64: 1>, scalar_prefetch = 0 : i64, scratch_operands = 0 : i64, tpu.core_type = #tpu.core_type<tc>, window_params = [{transform_indices = @transform_0, window_bounds = array<i64: 128, 128>}, {pipeline_mode = #tpu.pipeline_mode<synchronous>, transform_indices = @transform_1, window_bounds = array<i64: 128, 128>}, {pipeline_mode = #tpu.pipeline_mode<synchronous>, transform_indices = @transform_2, window_bounds = array<i64: 1, 128>}, {transform_indices = @transform_3, window_bounds = array<i64: 128, 128>}]} {
    %c0 = arith.constant 0 : index
    %c0_0 = arith.constant 0 : index
    %0 = vector.load %arg1[%c0, %c0_0] : memref<128x128xf32, #tpu.memory_space<vmem>>, vector<128x128xf32>
    %1 = arith.truncf %0 : vector<128x128xf32> to vector<128x128xbf16>
    %c0_1 = arith.constant 0 : index
    %c0_2 = arith.constant 0 : index
    %2 = vector.load %arg2[%c0_1, %c0_2] : memref<128x128xbf16, #tpu.memory_space<vmem>>, vector<128x128xbf16>
    %c0_3 = arith.constant 0 : index
    %c0_4 = arith.constant 0 : index
    %3 = vector.load %arg3[%c0_3, %c0_4] : memref<1x128xf32, #tpu.memory_space<vmem>>, vector<1x128xf32>
    %cst = arith.constant dense<0.000000e+00> : vector<128x128xf32>
    %4 = tpu.matmul %1, %2, %cst {dimension_numbers = #tpu.dot_dimension_numbers<[1], [0], [0], [1], [0, 0, 1, 1], [], []>} : vector<128x128xbf16>, vector<128x128xbf16>, vector<128x128xf32> -> vector<128x128xf32>
    %5 = vector.broadcast %3 : vector<1x128xf32> to vector<128x128xf32>
    %6 = arith.addf %4, %5 : vector<128x128xf32>
    %c0_5 = arith.constant 0 : index
    %c0_6 = arith.constant 0 : index
    %7 = vector.load %arg4[%c0_5, %c0_6] : memref<128x128xf32, #tpu.memory_space<vmem>>, vector<128x128xf32>
    tpu.vector_store %arg4[%c0_5, %c0_6], %6 {strides = array<i32>} : memref<128x128xf32, #tpu.memory_space<vmem>>, vector<128x128xf32>,
    return
  }
  func.func @transform_0(%arg0: i32) -> (i32, i32) {
    %c0_i32 = arith.constant 0 : i32
    %c0_i32_0 = arith.constant 0 : i32
    return %arg0, %c0_i32 : i32, i32
  }
  func.func @transform_1(%arg0: i32) -> (i32, i32) {
    %c0_i32 = arith.constant 0 : i32
    %c0_i32_0 = arith.constant 0 : i32
    %c0_i32_1 = arith.constant 0 : i32
    return %c0_i32, %c0_i32_0 : i32, i32
  }
  func.func @transform_2(%arg0: i32) -> (i32, i32) {
    %c0_i32 = arith.constant 0 : i32
    %c0_i32_0 = arith.constant 0 : i32
    %c0_i32_1 = arith.constant 0 : i32
    return %c0_i32, %c0_i32_0 : i32, i32
  }
  func.func @transform_3(%arg0: i32) -> (i32, i32) {
    %c0_i32 = arith.constant 0 : i32
    %c0_i32_0 = arith.constant 0 : i32
    return %arg0, %c0_i32 : i32, i32
  }
}

</mosaic_0001>

<bundles_post_ra>
// kernel: tpu_custom_call.1
= control target key start
LH: loop header
LB: loop body
LE: loop exit
PB: predicated region body
PF: predicated region fallthrough
CT: control target
= control target key end

     0   :  { %8 = vsyncpa [#allocation3], 0  ;;  %s469_s0 = inlined_call_operand.hbm [shape: f32[128,128], index: 0, kind: input, shape index: {}]   ;;  %s470_s1 = inlined_call_operand.hbm [shape: bf16[128,128], index: 1, kind: input, shape index: {}]   ;;  %s471_s2 = inlined_call_operand.vmem [shape: f32[1,128], index: 2, kind: input, shape index: {}]   ;;  %s472_s3 = inlined_call_operand.hbm [shape: f32[128,128], index: 3, kind: output, shape index: {}]  }
   0x1   :  { %9 = vsyncpa [#allocation6], 0 }
   0x2   :  { %10 = vsyncpa [#allocation4], 0  ;;  %s424_s12 = smov [#allocation2]  }
   0x3   :  { %s16_s13 = sshll.u32 %s424_s12, 4  ;;  %s17_s13 = int_to_ptr.vmem [resolvable:$true] %s16_s13 }
   0x4   :  { %s366_s14 = scalar_lea.vmem %s17_s13, 2048  ;;  %p371_p1 = scmp.lt.s32.totalorder %s17_s13, %s17_s13 }
   0x5   :  { %p367_p0 = scmp.ne.s32.totalorder %s17_s13, %s366_s14  ;;  %p372_p2 = scmp.lt.s32.totalorder %s366_s14, %s366_s14 }
   0x7   :  { %p373_p3 = por %p372_p2, %p371_p1 }
   0x9   :  { %p374_p4 = pnand %p373_p3, %p367_p0 }
   0xb   :  { %377 = shalt.err (!%p374_p4)
}
   0xc   :  { %s425_s15 = smov 128   ;;  %s426_s16 = smov 8  }
   0xd   :  { %22 = dma.hbm_to_vmem [thread:$0]  %s469_s0, 2048, %s17_s13, [#allocation3], %s425_s15, %s425_s15, %s426_s16  }
   0xe   :  { %s427_s19 = smov [#allocation5]  }
   0xf   :  { %s28_s20 = sshll.u32 %s427_s19, 4  ;;  %s29_s20 = int_to_ptr.vmem [resolvable:$true] %s28_s20 }
  0x10   :  { %s386_s21 = scalar_lea.vmem %s29_s20, 1024  ;;  %p391_p6 = scmp.lt.s32.totalorder %s29_s20, %s29_s20 }
  0x11   :  { %p387_p5 = scmp.ne.s32.totalorder %s29_s20, %s386_s21  ;;  %p392_p7 = scmp.lt.s32.totalorder %s386_s21, %s386_s21 }
  0x13   :  { %p393_p8 = por %p392_p7, %p391_p6 }
  0x15   :  { %p394_p9 = pnand %p393_p8, %p387_p5 }
  0x17   :  { %397 = shalt.err (!%p394_p9)
}
  0x18   :  { %s428_s22 = smov 64   ;;  %s429_s23 = smov 4  }
  0x19   :  { %34 = dma.hbm_to_vmem [thread:$0]  %s470_s1, 1024, %s29_s20, [#allocation6], %s428_s22, %s428_s22, %s429_s23  }
  0x1a   :  { %418 = dma.done.wait [#allocation3], 2048  }
  0x1b   :  { %419 = vsyncadd [#allocation3], 4294965248 }
  0x1c   :  { %420 = dma.done.wait [#allocation6], 1024  }
  0x1d   :  { %421 = vsyncadd [#allocation6], 4294966272  ;;  %v350_v0 = vld [vmem:[#allocation5 + $0x38] sm:$0xff]   ;;  %v351_v1 = vld [vmem:[#allocation5 + $0x30] sm:$0xff]  }
  0x1e   :  { %295 = vmatprep.subr.bf16.mxu0 %v350_v0  ;;  %327 = vmatprep.subr.bf16.mxu1 %v350_v0  ;;  %v352_v2 = vld [vmem:[#allocation5 + $0x28] sm:$0xff]   ;;  %v353_v3 = vld [vmem:[#allocation5 + $0x20] sm:$0xff]   ;;  %v354_v10 = vld [vmem:[#allocation5 + $0x18] sm:$0xff]  }
  0x1f   :  { %296 = vmatpush3.bf16.msra.mxu0 %v350_v0  ;;  %335 = vmatpush3.bf16.msra.mxu1 %v350_v0  ;;  %v44_v4 = vld [vmem:[#allocation2] sm:$0xff]  ;;  %v45_v5 = vld [vmem:[#allocation2 + $0x8] sm:$0xff]  ;;  %v355_v11 = vld [vmem:[#allocation5 + $0x10] sm:$0xff]  }
  0x20   :  { %297 = vmatprep.subr.bf16.mxu0 %v351_v1  ;;  %328 = vmatprep.subr.bf16.mxu1 %v351_v1  ;;  %v52_v6 = vld [vmem:[#allocation2 + $0x40] sm:$0xff]  ;;  %v60_v7 = vpack.c.bf16 %v45_v5, %v44_v4  ;;  %v53_v8 = vld [vmem:[#allocation2 + $0x48] sm:$0xff]  ;;  %v46_v14 = vld [vmem:[#allocation2 + $0x10] sm:$0xff] }
  0x21   :  { %v64_v9 = vpack.c.bf16 %v53_v8, %v52_v6  ;;  %v356_v12 = vld [vmem:[#allocation5 + $0x8] sm:$0xff]   ;;  %v357_v13 = vld [vmem:[#allocation5] sm:$0xff]   ;;  %v47_v15 = vld [vmem:[#allocation2 + $0x18] sm:$0xff] }
  0x22   :  { %311 = vmatprep.mubr.bf16.mxu0 %v60_v7  ;;  %v54_v16 = vld [vmem:[#allocation2 + $0x50] sm:$0xff]  ;;  %v55_v17 = vld [vmem:[#allocation2 + $0x58] sm:$0xff]  ;;  %v48_v18 = vld [vmem:[#allocation2 + $0x20] sm:$0xff]  ;;  %v61_v22 = vpack.c.bf16 %v47_v15, %v46_v14 }
  0x23   :  { %298 = vmatpush3.bf16.msra.mxu0 %v351_v1  ;;  %336 = vmatpush3.bf16.msra.mxu1 %v351_v1  ;;  %v49_v19 = vld [vmem:[#allocation2 + $0x28] sm:$0xff]  ;;  %v56_v20 = vld [vmem:[#allocation2 + $0x60] sm:$0xff]  ;;  %v65_v23 = vpack.c.bf16 %v55_v17, %v54_v16  ;;  %v50_v26 = vld [vmem:[#allocation2 + $0x30] sm:$0xff] }
  0x24   :  { %299 = vmatprep.subr.bf16.mxu0 %v352_v2  ;;  %329 = vmatprep.subr.bf16.mxu1 %v352_v2  ;;  %v57_v21 = vld [vmem:[#allocation2 + $0x68] sm:$0xff]  ;;  %v62_v24 = vpack.c.bf16 %v49_v19, %v48_v18  ;;  %v51_v27 = vld [vmem:[#allocation2 + $0x38] sm:$0xff]  ;;  %v58_v28 = vld [vmem:[#allocation2 + $0x70] sm:$0xff] }
  0x25   :  { %319 = vmatprep.mubr.bf16.mxu1 %v64_v9  ;;  %v66_v25 = vpack.c.bf16 %v57_v21, %v56_v20  ;;  %v59_v29 = vld [vmem:[#allocation2 + $0x78] sm:$0xff]  ;;  %v63_v30 = vpack.c.bf16 %v51_v27, %v50_v26  ;;  %v270_v32 = vld [vmem:[%s471_s2] ss:$0 sm:$0xff]  ;;  %s430_s2 = smov [#allocation7]  }
  0x26   :  { %v67_v31 = vpack.c.bf16 %v59_v29, %v58_v28  ;;  %s257_s26 = sshll.u32 %s430_s2, 4  ;;  %s258_s26 = int_to_ptr.vmem [resolvable:$true] %s257_s26 }
  0x27   :  { %300 = vmatpush3.bf16.msra.mxu0 %v352_v2  ;;  %337 = vmatpush3.bf16.msra.mxu1 %v352_v2  ;;  %s398_s27 = scalar_lea.vmem %s258_s26, 2048  ;;  %p403_p11 = scmp.lt.s32.totalorder %s258_s26, %s258_s26 }
  0x28   :  { %301 = vmatprep.subr.bf16.mxu0 %v353_v3  ;;  %330 = vmatprep.subr.bf16.mxu1 %v353_v3  ;;  %p399_p10 = scmp.ne.s32.totalorder %s258_s26, %s398_s27  ;;  %p404_p12 = scmp.lt.s32.totalorder %s398_s27, %s398_s27 }
  0x2a   :  { %p405_p13 = por %p404_p12, %p403_p11 }
  0x2b   :  { %302 = vmatpush3.bf16.msra.mxu0 %v353_v3  ;;  %338 = vmatpush3.bf16.msra.mxu1 %v353_v3 }
  0x2c   :  { %303 = vmatprep.subr.bf16.mxu0 %v354_v10  ;;  %331 = vmatprep.subr.bf16.mxu1 %v354_v10  ;;  %p406_p0 = pnand %p405_p13, %p399_p10 }
  0x2f   :  { %304 = vmatpush3.bf16.msra.mxu0 %v354_v10  ;;  %339 = vmatpush3.bf16.msra.mxu1 %v354_v10 }
  0x30   :  { %305 = vmatprep.subr.bf16.mxu0 %v355_v11  ;;  %332 = vmatprep.subr.bf16.mxu1 %v355_v11 }
  0x33   :  { %306 = vmatpush3.bf16.msra.mxu0 %v355_v11  ;;  %340 = vmatpush3.bf16.msra.mxu1 %v355_v11 }
  0x34   :  { %307 = vmatprep.subr.bf16.mxu0 %v356_v12  ;;  %333 = vmatprep.subr.bf16.mxu1 %v356_v12 }
  0x37   :  { %308 = vmatpush3.bf16.msra.mxu0 %v356_v12  ;;  %341 = vmatpush3.bf16.msra.mxu1 %v356_v12 }
  0x38   :  { %309 = vmatprep.subr.bf16.mxu0 %v357_v13  ;;  %334 = vmatprep.subr.bf16.mxu1 %v357_v13 }
  0x3b   :  { %310 = vmatpush3.bf16.msra.mxu0 %v357_v13  ;;  %342 = vmatpush3.bf16.msra.mxu1 %v357_v13 }
  0x3e   :  { %312 = vmatmul.mubr.bf16.vlgmr.msra.gmra.mxu0 %v61_v22  ;;  %320 = vmatmul.mubr.bf16.vlgmr.msra.gmra.mxu1 %v65_v23 }
  0x3f   :  { %315 = vmatprep.mubr.bf16.mxu0 %v62_v24  ;;  %323 = vmatprep.mubr.bf16.mxu1 %v66_v25 }
  0x46   :  { %316 = vmatmul.mubr.bf16.gmra.mxu0 %v63_v30  ;;  %324 = vmatmul.mubr.bf16.gmra.mxu1 %v67_v31 }
  0xfe   :  { %v313_v33 = vpop.f32.mrf.mxu0  ;;  %v321_v34 = vpop.f32.mrf.mxu1 }
  0xff   :  { %v182_v35 = vadd.f32 %v313_v33, %v270_v32  ;;  %v214_v36 = vadd.f32 %v321_v34, %v270_v32 }
 0x100   :  { %v173_v37 = vpop.f32.mrf.mxu0  ;;  %v205_v38 = vpop.f32.mrf.mxu1 }
 0x101   :  { %238 = vst [vmem:[#allocation7 + $0x10] sm:$0xff] %v182_v35  ;;  %246 = vst [vmem:[#allocation7 + $0x50] sm:$0xff] %v214_v36  ;;  %v174_v39 = vadd.f32 %v270_v32, %v173_v37  ;;  %v206_v40 = vadd.f32 %v270_v32, %v205_v38 }
 0x102   :  { %v314_v41 = vpop.f32.mrf.mxu0  ;;  %v322_v42 = vpop.f32.mrf.mxu1 }
 0x103   :  { %236 = vst [vmem:[#allocation7] sm:$0xff] %v174_v39  ;;  %244 = vst [vmem:[#allocation7 + $0x40] sm:$0xff] %v206_v40  ;;  %v185_v43 = vadd.f32 %v314_v41, %v270_v32  ;;  %v217_v44 = vadd.f32 %v322_v42, %v270_v32 }
 0x104   :  { %v176_v45 = vpop.f32.mrf.mxu0  ;;  %v208_v46 = vpop.f32.mrf.mxu1 }
 0x105   :  { %239 = vst [vmem:[#allocation7 + $0x18] sm:$0xff] %v185_v43  ;;  %247 = vst [vmem:[#allocation7 + $0x58] sm:$0xff] %v217_v44  ;;  %v177_v47 = vadd.f32 %v270_v32, %v176_v45  ;;  %v209_v48 = vadd.f32 %v270_v32, %v208_v46 }
 0x106   :  { %v317_v49 = vpop.f32.mrf.mxu0  ;;  %v325_v50 = vpop.f32.mrf.mxu1 }
 0x107   :  { %237 = vst [vmem:[#allocation7 + $0x8] sm:$0xff] %v177_v47  ;;  %245 = vst [vmem:[#allocation7 + $0x48] sm:$0xff] %v209_v48  ;;  %v198_v51 = vadd.f32 %v317_v49, %v270_v32  ;;  %v230_v52 = vadd.f32 %v325_v50, %v270_v32 }
 0x108   :  { %v189_v53 = vpop.f32.mrf.mxu0  ;;  %v221_v54 = vpop.f32.mrf.mxu1 }
 0x109   :  { %242 = vst [vmem:[#allocation7 + $0x30] sm:$0xff] %v198_v51  ;;  %250 = vst [vmem:[#allocation7 + $0x70] sm:$0xff] %v230_v52  ;;  %v190_v55 = vadd.f32 %v270_v32, %v189_v53  ;;  %v222_v56 = vadd.f32 %v270_v32, %v221_v54 }
 0x10a   :  { %v318_v57 = vpop.f32.mrf.mxu0  ;;  %v326_v58 = vpop.f32.mrf.mxu1 }
 0x10b   :  { %240 = vst [vmem:[#allocation7 + $0x20] sm:$0xff] %v190_v55  ;;  %248 = vst [vmem:[#allocation7 + $0x60] sm:$0xff] %v222_v56  ;;  %v201_v59 = vadd.f32 %v318_v57, %v270_v32  ;;  %v233_v60 = vadd.f32 %v326_v58, %v270_v32 }
 0x10c   :  { %v192_v61 = vpop.f32.mrf.mxu0  ;;  %v224_v62 = vpop.f32.mrf.mxu1 }
 0x10d   :  { %243 = vst [vmem:[#allocation7 + $0x38] sm:$0xff] %v201_v59  ;;  %251 = vst [vmem:[#allocation7 + $0x78] sm:$0xff] %v233_v60  ;;  %v193_v63 = vadd.f32 %v270_v32, %v192_v61  ;;  %v225_v0 = vadd.f32 %v270_v32, %v224_v62 }
 0x10f   :  { %241 = vst [vmem:[#allocation7 + $0x28] sm:$0xff] %v193_v63  ;;  %249 = vst [vmem:[#allocation7 + $0x68] sm:$0xff] %v225_v0 }
 0x110   :  { %409 = shalt.err (!%p406_p0)
}
 0x111   :  { %263 = dma.vmem_to_hbm [thread:$0]  %s258_s26, 2048, %s472_s3, [#allocation4], %s425_s15, %s425_s15, %s426_s16  }
 0x112   :  { %422 = dma.done.wait [#allocation4], 2048  }
 0x113   :  { %423 = vsyncadd [#allocation4], 4294965248 }
 0x114   :  { %267 = vsyncpa [#allocation3], 1 }
 0x115   :  { %268 = vsyncpa [#allocation6], 1 }
 0x116   :  { %269 = vsyncpa [#allocation4], 1 }

</bundles_post_ra>
